<compile_context>
chip_gen: v7x
topology: tpu7x:2x2x1
jax: 0.10.0
libtpu: 0.0.40
codegen_flags: <defaults>
</compile_context>

<pallas_src>
import functools

import jax
import jax.numpy as jnp
from jax.experimental import pallas as pl
from jax.experimental.pallas import tpu as pltpu


def _derived_model_loss_kernel(x_ref, w1_ref, b1_ref, w2_ref, b2_ref, partial_ref, *,
                               batch, block_rows, mask_tail):
    x = x_ref[...]                                                        # (tb, D)

    # pre_output: Linear(D -> H) on the MXU; bias + ReLU on the VPU (f32).
    h = jnp.dot(x, w1_ref[...], preferred_element_type=jnp.float32)      # (tb, H)
    h = jnp.maximum(h + b1_ref[...], 0.0)

    # output: Linear(H -> 1) as a VPU broadcast-mul + lane (XLU) reduction,
    # keeping the width-1 second layer off the MXU.
    logits = jnp.sum(h * w2_ref[...], axis=-1, keepdims=True) + b2_ref[0]  # (tb, 1)

    # BCEWithLogitsLoss(reduction='mean') against all-ones targets:
    #   per-row loss = softplus(-logits), numerically stable form.
    per = jnp.maximum(-logits, 0.0) + jnp.log1p(jnp.exp(-jnp.abs(logits)))  # (tb, 1)

    if mask_tail:  # emitted only when B % tb != 0 (trace-time Python check)
        row = (pl.program_id(0) * block_rows
               + jax.lax.broadcasted_iota(jnp.int32, per.shape, 0))
        per = jnp.where(row < batch, per, 0.0)

    # Per-block partial sum broadcast into a conforming (8,128) tile: no resident
    # accumulator, so the batch grid axis can stay "parallel" (v7x megacore-shardable).
    partial_ref[...] = jnp.full(partial_ref.shape, jnp.sum(per), dtype=jnp.float32)


def prepare_params(w1, b1, w2, b2):
    """One-time parameter prep (outside the per-call hot path).

    Torch nn.Linear layout in: w1 (H, D), b1 (H,), w2 (1, H), b2 (1,).
    Out: w1_t (D, H), b1_row (1, H), w2_row (1, H), b2_vec (1,).
    """
    w1_t = jnp.asarray(w1, jnp.float32).T                 # (D, H) — transposed ONCE here
    b1_row = jnp.asarray(b1, jnp.float32).reshape(1, -1)  # (1, H)
    w2_row = jnp.asarray(w2, jnp.float32).reshape(1, -1)  # (1, H) row for VPU reduce
    b2_vec = jnp.asarray(b2, jnp.float32).reshape(-1)     # (1,) scalar bias -> SMEM
    return w1_t, b1_row, w2_row, b2_vec


def derived_model_loss(features, w1_t, b1_row, w2_row, b2_vec, *, block_b=2048):
    """features: (B, D).  Params as produced by prepare_params()."""
    B, D = features.shape
    H = w1_t.shape[1]

    # Batch tile: full batch for small B (block == full dim is allowed), else a
    # multiple-of-8 tile; any tail block is masked inside the kernel.
    if B <= block_b:
        tb = B
    else:
        tb = max(8, (block_b // 8) * 8)
    nb = pl.cdiv(B, tb)
    mask_tail = (B % tb) != 0

    kernel = functools.partial(_derived_model_loss_kernel,
                               batch=B, block_rows=tb, mask_tail=mask_tail)

    # Explicit VMEM budget: double-buffered feature tiles dominate. Raise past v5e's
    # 16 MiB scoped default for big tiles, but cap below v7x's 64 MiB physical VMEM.
    est_bytes = (2 * tb * D + 2 * D * H + 4 * H + 4 * 8 * 128) * 4
    vmem_limit = int(min(max(est_bytes + (8 << 20), 32 << 20), 48 << 20))

    partials = pl.pallas_call(
        kernel,
        out_shape=jax.ShapeDtypeStruct((nb * 8, 128), jnp.float32),
        grid=(nb,),
        in_specs=[
            pl.BlockSpec((tb, D), lambda i: (i, 0)),            # features: pipelined over B
            pl.BlockSpec((D, H), lambda i: (0, 0)),             # W1^T, resident
            pl.BlockSpec((1, H), lambda i: (0, 0)),             # b1 row, resident
            pl.BlockSpec((1, H), lambda i: (0, 0)),             # W2 row, resident
            pl.BlockSpec(memory_space=pltpu.MemorySpace.SMEM),  # b2 scalar in SMEM
        ],
        out_specs=pl.BlockSpec((8, 128), lambda i: (i, 0)),     # per-block partial tile
        compiler_params=pltpu.CompilerParams(
            dimension_semantics=("parallel",),                  # no resident state -> megacore OK
            vmem_limit_bytes=vmem_limit,
        ),
    )(features, w1_t, b1_row, w2_row, b2_vec)

    per_block = partials.reshape(nb, 8, 128)[:, 0, 0]           # exact per-block sums
    return jnp.sum(per_block) / B


def _reference_loss(features, w1, b1, w2, b2):
    """Pure-JAX reference in torch layouts: w1 (H, D), b1 (H,), w2 (1, H), b2 (1,)."""
    h = jnp.maximum(features @ w1.T + b1, 0.0)
    logits = (h @ w2.T + b2)[:, 0]
    return jnp.mean(jnp.maximum(-logits, 0.0) + jnp.log1p(jnp.exp(-jnp.abs(logits))))


if __name__ == "__main__":
    # Shapes consistent with the module: features = (B, map_dim**2); map_dim = 8 -> D = 64.
    D, H = 64, 32

    key = jax.random.PRNGKey(0)
    k_x1, k_x2, k_x3, k_w1, k_b1, k_w2, k_b2 = jax.random.split(key, 7)

    # Deterministic synthetic parameters (torch nn.Linear layout: weight = (out, in)).
    w1 = jax.random.normal(k_w1, (H, D), jnp.float32) * (1.0 / jnp.sqrt(D))
    b1 = jax.random.normal(k_b1, (H,), jnp.float32) * 0.01
    w2 = jax.random.normal(k_w2, (1, H), jnp.float32) * (1.0 / jnp.sqrt(H))
    b2 = jax.random.normal(k_b2, (1,), jnp.float32) * 0.01

    params = prepare_params(w1, b1, w2, b2)   # done once, outside the hot path

    # 1) Small-batch case (single grid step, block == full batch).
    feats_small = jax.random.normal(k_x1, (2, D), jnp.float32)
    loss_small = jax.block_until_ready(derived_model_loss(feats_small, *params))
    ref_small = jax.block_until_ready(_reference_loss(feats_small, w1, b1, w2, b2))
    assert jnp.allclose(loss_small, ref_small, rtol=2e-5, atol=2e-5), (loss_small, ref_small)

    # 2) Gridded, evenly divisible case (parallel partials, mask statically elided).
    feats_even = jax.random.normal(k_x2, (256, D), jnp.float32)
    loss_even = jax.block_until_ready(derived_model_loss(feats_even, *params, block_b=128))
    ref_even = jax.block_until_ready(_reference_loss(feats_even, w1, b1, w2, b2))
    assert jnp.allclose(loss_even, ref_even, rtol=2e-5, atol=2e-5), (loss_even, ref_even)

    # 3) Gridded case with a ragged tail block (exercises the in-kernel mask).
    feats_big = jax.random.normal(k_x3, (300, D), jnp.float32)
    loss_big = jax.block_until_ready(derived_model_loss(feats_big, *params, block_b=128))
    ref_big = jax.block_until_ready(_reference_loss(feats_big, w1, b1, w2, b2))
    assert jnp.allclose(loss_big, ref_big, rtol=2e-5, atol=2e-5), (loss_big, ref_big)

    print("KERNEL_OK")
</pallas_src>

<mosaic_0001>
module attributes {stable_mosaic.version = 11 : i64} {
  func.func @_derived_model_loss_kernel(%arg0: i32, %arg1: memref<2x64xf32, #tpu.memory_space<vmem>>, %arg2: memref<64x32xf32, #tpu.memory_space<vmem>>, %arg3: memref<1x32xf32, #tpu.memory_space<vmem>>, %arg4: memref<1x32xf32, #tpu.memory_space<vmem>>, %arg5: memref<1xf32, #tpu.memory_space<smem>>, %arg6: memref<8x128xf32, #tpu.memory_space<vmem>>) attributes {dimension_semantics = [#tpu.dimension_semantics<parallel>], iteration_bounds = array<i64: 1>, scalar_prefetch = 0 : i64, scratch_operands = 0 : i64, tpu.core_type = #tpu.core_type<tc>, window_params = [{transform_indices = @transform_0, window_bounds = array<i64: 2, 64>}, {pipeline_mode = #tpu.pipeline_mode<synchronous>, transform_indices = @transform_1, window_bounds = array<i64: 64, 32>}, {pipeline_mode = #tpu.pipeline_mode<synchronous>, transform_indices = @transform_2, window_bounds = array<i64: 1, 32>}, {pipeline_mode = #tpu.pipeline_mode<synchronous>, transform_indices = @transform_3, window_bounds = array<i64: 1, 32>}, {transform_indices = @transform_4, window_bounds = array<i64: 1>}, {transform_indices = @transform_5, window_bounds = array<i64: 8, 128>}]} {
    %c0 = arith.constant 0 : index
    %c0_0 = arith.constant 0 : index
    %0 = vector.load %arg1[%c0, %c0_0] : memref<2x64xf32, #tpu.memory_space<vmem>>, vector<2x64xf32>
    %c0_1 = arith.constant 0 : index
    %c0_2 = arith.constant 0 : index
    %1 = vector.load %arg2[%c0_1, %c0_2] : memref<64x32xf32, #tpu.memory_space<vmem>>, vector<64x32xf32>
    %cst = arith.constant dense<0.000000e+00> : vector<2x32xf32>
    %2 = tpu.matmul %0, %1, %cst {dimension_numbers = #tpu.dot_dimension_numbers<[1], [0], [0], [1], [0, 0, 1, 1], [], []>} : vector<2x64xf32>, vector<64x32xf32>, vector<2x32xf32> -> vector<2x32xf32>
    %c0_3 = arith.constant 0 : index
    %c0_4 = arith.constant 0 : index
    %3 = vector.load %arg3[%c0_3, %c0_4] : memref<1x32xf32, #tpu.memory_space<vmem>>, vector<1x32xf32>
    %4 = vector.broadcast %3 : vector<1x32xf32> to vector<2x32xf32>
    %5 = arith.addf %2, %4 : vector<2x32xf32>
    %cst_5 = arith.constant 0.000000e+00 : f32
    %6 = vector.broadcast %cst_5 : f32 to vector<2x32xf32>
    %7 = arith.maximumf %5, %6 : vector<2x32xf32>
    %c0_6 = arith.constant 0 : index
    %c0_7 = arith.constant 0 : index
    %8 = vector.load %arg4[%c0_6, %c0_7] : memref<1x32xf32, #tpu.memory_space<vmem>>, vector<1x32xf32>
    %9 = vector.broadcast %8 : vector<1x32xf32> to vector<2x32xf32>
    %10 = arith.mulf %7, %9 : vector<2x32xf32>
    %cst_8 = arith.constant dense<0.000000e+00> : vector<2xf32>
    %11 = vector.multi_reduction <add>, %10, %cst_8 [1] : vector<2x32xf32> to vector<2xf32>
    %12 = vector.shape_cast %11 : vector<2xf32> to vector<2x1xf32>
    %c0_9 = arith.constant 0 : index
    %13 = memref.load %arg5[%c0_9] : memref<1xf32, #tpu.memory_space<smem>>
    %14 = vector.broadcast %13 : f32 to vector<2x1xf32>
    %15 = arith.addf %12, %14 : vector<2x1xf32>
    %cst_10 = arith.constant 0.000000e+00 : f32
    %16 = vector.broadcast %cst_10 : f32 to vector<2x1xf32>
    %17 = arith.subf %16, %15 : vector<2x1xf32>
    %cst_11 = arith.constant 0.000000e+00 : f32
    %18 = vector.broadcast %cst_11 : f32 to vector<2x1xf32>
    %19 = arith.maximumf %17, %18 : vector<2x1xf32>
    %20 = math.absf %15 : vector<2x1xf32>
    %cst_12 = arith.constant 0.000000e+00 : f32
    %21 = vector.broadcast %cst_12 : f32 to vector<2x1xf32>
    %22 = arith.subf %21, %20 : vector<2x1xf32>
    %23 = math.exp %22 : vector<2x1xf32>
    %24 = math.log1p %23 : vector<2x1xf32>
    %25 = arith.addf %19, %24 : vector<2x1xf32>
    %26 = vector.shape_cast %25 : vector<2x1xf32> to vector<1x2x1xf32>
    %cst_13 = arith.constant dense<0.000000e+00> : vector<1xf32>
    %27 = vector.multi_reduction <add>, %26, %cst_13 [1, 2] : vector<1x2x1xf32> to vector<1xf32>
    %28 = vector.shape_cast %27 : vector<1xf32> to vector<1x1x1xf32>
    %29 = vector.extract %28[0, 0, 0] : f32 from vector<1x1x1xf32>
    %30 = vector.broadcast %29 : f32 to vector<8x128xf32>
    %c0_14 = arith.constant 0 : index
    %c0_15 = arith.constant 0 : index
    %31 = vector.load %arg6[%c0_14, %c0_15] : memref<8x128xf32, #tpu.memory_space<vmem>>, vector<8x128xf32>
    tpu.vector_store %arg6[%c0_14, %c0_15], %30 {strides = array<i32>} : memref<8x128xf32, #tpu.memory_space<vmem>>, vector<8x128xf32>,
    return
  }
  func.func @transform_0(%arg0: i32) -> (i32, i32) {
    %c0_i32 = arith.constant 0 : i32
    %c0_i32_0 = arith.constant 0 : i32
    return %arg0, %c0_i32 : i32, i32
  }
  func.func @transform_1(%arg0: i32) -> (i32, i32) {
    %c0_i32 = arith.constant 0 : i32
    %c0_i32_0 = arith.constant 0 : i32
    %c0_i32_1 = arith.constant 0 : i32
    return %c0_i32, %c0_i32_0 : i32, i32
  }
  func.func @transform_2(%arg0: i32) -> (i32, i32) {
    %c0_i32 = arith.constant 0 : i32
    %c0_i32_0 = arith.constant 0 : i32
    %c0_i32_1 = arith.constant 0 : i32
    return %c0_i32, %c0_i32_0 : i32, i32
  }
  func.func @transform_3(%arg0: i32) -> (i32, i32) {
    %c0_i32 = arith.constant 0 : i32
    %c0_i32_0 = arith.constant 0 : i32
    %c0_i32_1 = arith.constant 0 : i32
    return %c0_i32, %c0_i32_0 : i32, i32
  }
  func.func @transform_4(%arg0: i32) -> i32 {
    %c0_i32 = arith.constant 0 : i32
    %c0_i32_0 = arith.constant 0 : i32
    return %c0_i32 : i32
  }
  func.func @transform_5(%arg0: i32) -> (i32, i32) {
    %c0_i32 = arith.constant 0 : i32
    %c0_i32_0 = arith.constant 0 : i32
    return %arg0, %c0_i32 : i32, i32
  }
}

</mosaic_0001>

<bundles_post_ra>
// kernel: tpu_custom_call.1
= control target key start
LH: loop header
LB: loop body
LE: loop exit
PB: predicated region body
PF: predicated region fallthrough
CT: control target
= control target key end

     0   :  { %v248_v3 = vmov 0.0|0.0   ;;  %vm249_vm0 = vmmov 0   ;;  %v250_v6 = vmov 0.0   ;;  %s330_s0 = inlined_call_operand.vmem [shape: f32[2,64], index: 0, kind: input, shape index: {}]   ;;  %s331_s1 = inlined_call_operand.vmem [shape: f32[64,32], index: 1, kind: input, shape index: {}]   ;;  %s332_s2 = inlined_call_operand.vmem [shape: f32[1,32], index: 2, kind: input, shape index: {}]   ;;  %s333_s3 = inlined_call_operand.vmem [shape: f32[1,32], index: 3, kind: input, shape index: {}]   ;;  %s334_s4 = inlined_call_operand.<no memory space> [shape: f32[1], index: 4, kind: input, shape index: {}]   ;;  %s335_s5 = inlined_call_operand.hbm [shape: f32[8,128], index: 5, kind: output, shape index: {}]  }
   0x1   :  { %v23_v0 = vld [vmem:[%s331_s1] sm:$0xff]  ;;  %v24_v1 = vld [vmem:[%s331_s1 + $0x8] sm:$0xff]  ;;  %v25_v2 = vld [vmem:[%s331_s1 + $0x10] sm:$0xff]  ;;  %202 = vmatprep.subr.bf16.mxu0 %v248_v3  ;;  %199 = vmatprep.mubr.msk.f32.mxu0 %vm249_vm0, %v250_v6 }
   0x2   :  { %v203_v4 = vpack.c.bf16 %v24_v1, %v23_v0  ;;  %v26_v5 = vld [vmem:[%s331_s1 + $0x18] sm:$0xff] }
   0x3   :  { %v206_v7 = vpack.c.bf16 %v26_v5, %v25_v2 }
   0x4   :  { %204 = vmatpush3.bf16.msra.mxu0 %v203_v4 }
   0x5   :  { %11 = vsyncpa [#allocation4], 0  ;;  %205 = vmatprep.subr.bf16.mxu0 %v248_v3  ;;  %v27_v8 = vld [vmem:[%s331_s1 + $0x20] sm:$0xff]  ;;  %v28_v9 = vld [vmem:[%s331_s1 + $0x28] sm:$0xff]  ;;  %vm38_vm1 = vcmask 523264   ;;  %vm121_vm2 = vcmask 254976   ;;  %v126_v23 = vstv %s334_s4 }
   0x6   :  { %v209_v10 = vpack.c.bf16 %v28_v9, %v27_v8  ;;  %v29_v11 = vld [vmem:[%s331_s1 + $0x30] sm:$0xff]  ;;  %v30_v12 = vld [vmem:[%s331_s1 + $0x38] sm:$0xff]  ;;  %v22_v14 = vld [vmem:[%s330_s0] sm:$0x3]  ;;  %vm144_vm4 = vcmask 1024  }
   0x7   :  { %v212_v13 = vpack.c.bf16 %v30_v12, %v29_v11  ;;  %v171_v15 = vld [vmem:[%s332_s2] ss:$0 sm:$0xff]  ;;  %s251_s2 = smov [#allocation3]  }
   0x8   :  { %207 = vmatpush3.bf16.msra.mxu0 %v206_v7  ;;  %v173_v19 = vld [vmem:[%s333_s3] ss:$0 sm:$0xff]  ;;  %s163_s3 = sshll.u32 %s251_s2, 4  ;;  %s164_s3 = int_to_ptr.vmem [resolvable:$true] %s163_s3 }
   0x9   :  { %208 = vmatprep.subr.bf16.mxu0 %v248_v3  ;;  %s224_s15 = scalar_lea.vmem %s164_s3, 128  ;;  %p229_p1 = scmp.lt.s32.totalorder %s164_s3, %s164_s3 }
   0xa   :  { %p225_p0 = scmp.ne.s32.totalorder %s164_s3, %s224_s15  ;;  %p230_p2 = scmp.lt.s32.totalorder %s224_s15, %s224_s15 }
   0xc   :  { %210 = vmatpush3.bf16.msra.mxu0 %v209_v10  ;;  %p231_p3 = por %p230_p2, %p229_p1 }
   0xd   :  { %211 = vmatprep.subr.bf16.mxu0 %v248_v3 }
   0xe   :  { %p232_p4 = pnand %p231_p3, %p225_p0 }
  0x10   :  { %213 = vmatpush3.bf16.msra.mxu0 %v212_v13 }
  0x13   :  { %200 = vmatmul.mubr.msk.f32.vlgmr.msra.gmra.mrb[0].mxu0 %vm38_vm1, %v22_v14 }
  0xe6   :  { %v108_v16 = vpop.f32.mrb[0].mxu0 }
  0xe7   :  { %v109_v17 = vadd.f32 %v171_v15, %v108_v16  ;;  %v201_v18 = vpop.f32.mrb[1].mxu0 }
  0xe9   :  { %v112_v20 = vmax.f32 %v109_v17, 0.0 }
  0xeb   :  { %v120_v21 = vmul.f32 %v173_v19, %v112_v20 }
  0xed   :  { %v122_v22 = vsel %vm121_vm2, %v120_v21, 0.0 }
  0xee   :  { %123 = vadd.xlane.f32.xlu0 %v122_v22 }
 0x17b   :  { %v124_v24 = vpop.xlane.xlu0 %123 }
 0x17c   :  { %v127_v25 = vadd.f32 %v126_v23, %v124_v24 }
 0x17e   :  { %v130_v26 = vand.u32 2147483647, %v127_v25  ;;  %v128_v33 = vsub.f32 0.0, %v127_v25 }
 0x180   :  { %v131_v27 = vsub.f32 0.0, %v130_v26  ;;  %v129_v38 = vmax.f32 %v128_v33, 0.0 }
 0x182   :  { %v132_v28 = vmul.f32 1.442695, %v131_v27 }
 0x184   :  { %220 = vpow2.f32 %v132_v28 }
 0x18e   :  { %v221_v29 = vpop.eup %220 }
 0x18f   :  { %v134_v30 = vadd.f32 1.0, %v221_v29  ;;  %v137_v31 = vmul.f32 -0.5, %v221_v29  ;;  %v140_v34 = vand.u32 2147483647, %v221_v29 }
 0x191   :  { %222 = vlog2.f32 %v134_v30  ;;  %v138_v32 = vadd.f32 1.0, %v137_v31  ;;  %vm141_vm3 = vcmp.lt.f32.partialorder %v140_v34, 0.0004427343 }
 0x193   :  { %v139_v37 = vmul.f32 %v221_v29, %v138_v32 }
 0x19b   :  { %v223_v35 = vpop.eup %222 }
 0x19c   :  { %v136_v36 = vmul.f32 0.6931472, %v223_v35 }
 0x19e   :  { %v142_v39 = vsel %vm141_vm3, %v139_v37, %v136_v36 }
 0x19f   :  { %v143_v40 = vadd.f32 %v142_v39, %v129_v38 }
 0x1a1   :  { %v145_v41 = vsel %vm144_vm4, %v143_v40, 0.0 }
 0x1a2   :  { %146 = vadd.xlane.f32.xlu0 %v145_v41 }
 0x22f   :  { %v147_v42 = vpop.xlane.xlu0 %146 }
 0x230   :  { %v148_v43 = vrot.slane %v147_v42, 4 }
 0x232   :  { %v149_v44 = vadd.f32 %v148_v43, %v147_v42 }
 0x234   :  { %v150_v45 = vrot.slane %v149_v44, 2 }
 0x236   :  { %v151_v46 = vadd.f32 %v150_v45, %v149_v44 }
 0x238   :  { %v152_v47 = vrot.slane %v151_v46, 1 }
 0x23a   :  { %v153_v48 = vadd.f32 %v152_v47, %v151_v46 }
 0x23c   :  { %214 = vpush %v153_v48 }
 0x26d   :  { %s215_s4 = spop %214 }
 0x26e   :  { %v155_v49 = vstv %s215_s4 }
 0x26f   :  { %156 = vst [vmem:[#allocation3] sm:$0xff] %v155_v49 }
 0x270   :  { %235 = shalt.err (!%p232_p4)
}
 0x271   :  { %s236_s18 = scalar_lea.hbm %s335_s5, 128 }
 0x272   :  { %p237_p5 = scmp.ne.s32.totalorder %s335_s5, %s236_s18  ;;  %p240_p6 = scmp.lt.u32.totalorder %s236_s18, %s335_s5 }
 0x274   :  { %p242_p7 = pnand %p240_p6, %p237_p5 }
 0x276   :  { %245 = shalt.err (!%p242_p7)
}
 0x277   :  { %166 = dma.vmem_to_hbm [thread:$0]  %s164_s3, 128, %s335_s5, [#allocation4]  }
 0x278   :  { %246 = dma.done.wait [#allocation4], 128  }
 0x279   :  { %247 = vsyncadd [#allocation4], 4294967168 }
 0x27a   :  { %170 = vsyncpa [#allocation4], 1 }

</bundles_post_ra>
